<compile_context>
chip_gen: v5e
topology: v5e:2x2
jax: 0.10.0
libtpu: 0.0.40
codegen_flags: <defaults>
</compile_context>

<pallas_src>
import functools

import jax
import jax.numpy as jnp
from jax.experimental import pallas as pl
from jax.experimental.pallas import tpu as pltpu


def ffn_kernel(x_ref, w1_ref, b1_ref, w2_ref, b2_ref, o_ref, acc_ref, *,
               approximate_gelu):
    k = pl.program_id(1)

    @pl.when(k == 0)
    def _init():
        acc_ref[...] = jnp.zeros_like(acc_ref)

    # First linear on this hidden slab: [TM, E] @ [E, BH], fp32 accumulation on the MXU.
    x = x_ref[...].astype(w1_ref.dtype)            # feed the MXU its native dtype
    h = jnp.dot(x, w1_ref[...], preferred_element_type=jnp.float32)
    h = h + b1_ref[...]                            # fp32 bias
    # GELU: tanh form runs on the EUP (separate VLIW slot); approximate_gelu=False is the
    # exact erf form of torch.nn.GELU() (difference <~4e-4 per element).
    h = jax.nn.gelu(h, approximate=approximate_gelu)
    # Dropout: eval-mode identity (torch nn.Dropout is a no-op at inference).
    # Second linear: accumulate this slab's contribution: [TM, BH] @ [BH, E].
    acc_ref[...] += jnp.dot(h.astype(w2_ref.dtype), w2_ref[...],
                            preferred_element_type=jnp.float32)

    @pl.when(k == pl.num_programs(1) - 1)
    def _finalize():
        o_ref[...] = (acc_ref[...] + b2_ref[...]).astype(o_ref.dtype)


def _round_up(x, m):
    return ((x + m - 1) // m) * m


def _sublane_multiple(itemsize):
    # Sub-32-bit dtypes pack rows along sublanes: 8 rows fp32, 16 bf16, 32 int8/fp8.
    return {4: 8, 2: 16, 1: 32}.get(itemsize, 8)


def _default_vmem_limit():
    """~75% of this chip's VMEM (per-TensorCore on v7x), capped at 100 MiB."""
    try:
        cap = int(pltpu.get_tpu_info().vmem_capacity_bytes)
    except Exception:
        cap = 64 * 1024 * 1024          # conservative fallback = v7x per-core size
    return min((cap * 3) // 4, 100 * 1024 * 1024)


def _vmem_cost(block_t, block_h, w_buffers, E, w_isz, x_isz, o_isz):
    """Rough per-core VMEM footprint (bytes) of one pipelined step."""
    weights = w_buffers * 2 * E * block_h * w_isz        # W1 + W2 slabs
    biases = 2 * 2 * (block_h + E) * 4                   # fp32 b1/b2 (buffered)
    acts = block_t * E * (2 * x_isz + 2 * o_isz)         # double-buffered x in / out tiles
    acc = block_t * E * 4                                # fp32 accumulator scratch
    inter = 2 * block_t * block_h * 4                    # ~2 live fp32 H-wide GELU temps
    return weights + biases + acts + acc + int(1.3 * inter)  # +30% Mosaic scratch headroom


def _choose_tiles(T, E, H, w_isz, x_isz, o_isz, budget):
    """Pick (block_t, block_h).  block_h always divides H (or equals it)."""
    sub = _sublane_multiple(w_isz)                       # compute dtype == weight dtype
    align = 128 if T >= 256 else sub                     # 128-wide M tiles feed the MXU fully
    if T <= align:
        block_t = T                                      # single full-dim tile is always legal
    else:
        block_t = max(align, (min(T, 1024) // align) * align)
        # Keep >= 2 token tiles so the "parallel" axis splits across v7x's two TensorCores.
        block_t = min(block_t, _round_up(pl.cdiv(T, 2), align))

    def h_candidates():
        yield H                                          # full-H resident (single hidden step)
        bh = H
        while bh % 2 == 0 and (bh // 2) % 128 == 0:
            bh //= 2
            yield bh                                     # halved slabs: divide H, 128-aligned

    while True:
        for bh in h_candidates():
            w_buf = 1 if bh == H else 2                  # resident weights need only 1 buffer
            if _vmem_cost(block_t, bh, w_buf, E, w_isz, x_isz, o_isz) <= budget:
                return block_t, bh
        if block_t <= align:
            *_, bh = h_candidates()                      # smallest slab; let Mosaic cope
            return block_t, bh
        block_t = max(align, ((block_t // 2) // align) * align)


def feedforward(x, w1, b1, w2, b2, *, block_t=None, block_h=None,
                compute_dtype=jnp.bfloat16, approximate_gelu=True,
                vmem_limit_bytes=None):
    """x: [B, S, E]; w1: [E, H]; b1: [H]; w2: [H, E]; b2: [E]   (weights stored [in, out]).

    compute_dtype: MXU operand dtype (default bf16; accumulation, bias adds and GELU stay
    fp32; output keeps x's dtype).  Use jnp.float32 for full-precision operands.
    approximate_gelu: True = tanh GELU (EUP slot); False = exact erf (torch.nn.GELU default).
    """
    B, S, E = x.shape
    H = w1.shape[1]
    T = B * S
    out_dtype = x.dtype

    if compute_dtype is not None:
        w1 = w1.astype(compute_dtype)                    # weights live in VMEM in compute dtype
        w2 = w2.astype(compute_dtype)
    b1_2d = b1.reshape(1, H).astype(jnp.float32)
    b2_2d = b2.reshape(1, E).astype(jnp.float32)

    x_isz = jnp.dtype(x.dtype).itemsize                  # x streams as-is; cast happens in-kernel
    w_isz = jnp.dtype(w1.dtype).itemsize
    o_isz = jnp.dtype(out_dtype).itemsize

    if vmem_limit_bytes is None:
        vmem_limit_bytes = _default_vmem_limit()

    auto_t, auto_h = _choose_tiles(T, E, H, w_isz, x_isz, o_isz, vmem_limit_bytes)
    block_t = auto_t if block_t is None else max(1, min(int(block_t), T))
    block_h = auto_h if block_h is None else min(int(block_h), H)
    if block_h < H and H % block_h != 0:
        raise ValueError("block_h must divide H (ragged hidden slabs would corrupt the accumulator)")
    w_buf = 1 if block_h == H else 2

    n_t = pl.cdiv(T, block_t)
    n_h = H // block_h
    grid = (n_t, n_h)

    x2d = x.reshape(T, E)

    def _wspec(shape, index_map, buffers):
        if buffers == 1:                                 # grid-invariant -> single-buffer (halve VMEM)
            try:
                return pl.BlockSpec(shape, index_map, pipeline_mode=pl.Buffered(1))
            except TypeError:                            # older jax without pipeline_mode kwarg
                return pl.BlockSpec(shape, index_map)
        return pl.BlockSpec(shape, index_map)            # streamed slabs: default double-buffering

    cost = pl.CostEstimate(
        flops=4 * T * E * H,                             # two matmuls, 2*T*E*H each
        transcendentals=T * H,                           # tanh / erf in GELU
        bytes_accessed=T * E * (x_isz + o_isz)
        + 2 * E * H * w_isz * (1 if n_h == 1 else n_t)   # weights re-read per token tile if split
        + 4 * (H + E),
    )

    kernel = functools.partial(ffn_kernel, approximate_gelu=approximate_gelu)

    out2d = pl.pallas_call(
        kernel,
        out_shape=jax.ShapeDtypeStruct((T, E), out_dtype),
        grid=grid,
        in_specs=[
            pl.BlockSpec((block_t, E), lambda i, k: (i, 0)),        # activations stream over i
            _wspec((E, block_h), lambda i, k: (0, k), w_buf),       # W1 slab
            _wspec((1, block_h), lambda i, k: (0, k), w_buf),       # b1 slab (fp32)
            _wspec((block_h, E), lambda i, k: (k, 0), w_buf),       # W2 slab
            _wspec((1, E), lambda i, k: (0, 0), 1),                 # b2 (fp32, grid-invariant)
        ],
        out_specs=pl.BlockSpec((block_t, E), lambda i, k: (i, 0)),  # lane-dense when E % 128 == 0
        scratch_shapes=[pltpu.VMEM((block_t, E), jnp.float32)],     # fp32 accumulator
        compiler_params=pltpu.CompilerParams(
            dimension_semantics=("parallel", "arbitrary"),          # token tiles parallel, H last
            vmem_limit_bytes=int(vmem_limit_bytes),
        ),
        cost_estimate=cost,
    )(x2d, w1, b1_2d, w2, b2_2d)

    return out2d.reshape(B, S, E)


if __name__ == "__main__":
    # Small shapes consistent with the module: batch=2, seq=8, embed_dim=32, hidden_dim=64.
    # NOTE: real configs should keep E and H multiples of 128 (lane-dense stores, full MXU tiles).
    B, S, E, H = 2, 8, 32, 64
    key = jax.random.PRNGKey(0)
    kx, kw1, kb1, kw2, kb2 = jax.random.split(key, 5)

    x = jax.random.normal(kx, (B, S, E), dtype=jnp.float32)

    # nn.Linear-style uniform init, stored [in, out] (PyTorch keeps [out, in]; transpose once at setup).
    bound1 = 1.0 / (E ** 0.5)
    w1 = jax.random.uniform(kw1, (E, H), jnp.float32, -bound1, bound1)
    b1 = jax.random.uniform(kb1, (H,), jnp.float32, -bound1, bound1)
    bound2 = 1.0 / (H ** 0.5)
    w2 = jax.random.uniform(kw2, (H, E), jnp.float32, -bound2, bound2)
    b2 = jax.random.uniform(kb2, (E,), jnp.float32, -bound2, bound2)

    # Plain-JAX reference in full precision with the module's exact (erf) GELU; eval dropout = identity.
    hp = jax.lax.Precision.HIGHEST
    ref = jnp.dot(jax.nn.gelu(jnp.dot(x, w1, precision=hp) + b1, approximate=False),
                  w2, precision=hp) + b2

    # fp32-operand path: tolerance covers the tanh-vs-erf GELU approximation (<~4e-4 per hidden unit).
    out_f32 = feedforward(x, w1, b1, w2, b2, compute_dtype=jnp.float32)
    jax.block_until_ready(out_f32)
    assert out_f32.shape == (B, S, E)
    assert jnp.allclose(out_f32, ref, atol=2e-3, rtol=2e-3)

    # Default production path: bf16 MXU operands, fp32 accumulation.
    out_bf16 = feedforward(x, w1, b1, w2, b2)
    jax.block_until_ready(out_bf16)
    assert out_bf16.shape == (B, S, E)
    assert jnp.allclose(out_bf16, ref, atol=5e-2, rtol=5e-2)

    print("KERNEL_OK")
</pallas_src>

<mosaic_0001>
module attributes {stable_mosaic.version = 11 : i64} {
  func.func @ffn_kernel(%arg0: i32, %arg1: i32, %arg2: memref<8x32xf32, #tpu.memory_space<vmem>>, %arg3: memref<32x64xf32, #tpu.memory_space<vmem>>, %arg4: memref<1x64xf32, #tpu.memory_space<vmem>>, %arg5: memref<64x32xf32, #tpu.memory_space<vmem>>, %arg6: memref<1x32xf32, #tpu.memory_space<vmem>>, %arg7: memref<8x32xf32, #tpu.memory_space<vmem>>, %arg8: memref<8x32xf32, #tpu.memory_space<vmem>>) attributes {dimension_semantics = [#tpu.dimension_semantics<parallel>, #tpu.dimension_semantics<arbitrary>], iteration_bounds = array<i64: 2, 1>, scalar_prefetch = 0 : i64, scratch_operands = 1 : i64, tpu.core_type = #tpu.core_type<tc>, window_params = [{transform_indices = @transform_0, window_bounds = array<i64: 8, 32>}, {pipeline_mode = #tpu.pipeline_mode<synchronous>, transform_indices = @transform_1, window_bounds = array<i64: 32, 64>}, {pipeline_mode = #tpu.pipeline_mode<synchronous>, transform_indices = @transform_2, window_bounds = array<i64: 1, 64>}, {pipeline_mode = #tpu.pipeline_mode<synchronous>, transform_indices = @transform_3, window_bounds = array<i64: 64, 32>}, {pipeline_mode = #tpu.pipeline_mode<synchronous>, transform_indices = @transform_4, window_bounds = array<i64: 1, 32>}, {transform_indices = @transform_5, window_bounds = array<i64: 8, 32>}]} {
    %c0_i32 = arith.constant 0 : i32
    %0 = arith.cmpi eq, %arg1, %c0_i32 : i32
    %1 = arith.extui %0 : i1 to i32
    %c0_i32_0 = arith.constant 0 : i32
    %2 = arith.cmpi ne, %1, %c0_i32_0 : i32
    scf.if %2 {
      %cst_19 = arith.constant 0.000000e+00 : f32
      %30 = vector.broadcast %cst_19 : f32 to vector<8x32xf32>
      %c0_20 = arith.constant 0 : index
      %c0_21 = arith.constant 0 : index
      %31 = vector.load %arg8[%c0_20, %c0_21] : memref<8x32xf32, #tpu.memory_space<vmem>>, vector<8x32xf32>
      tpu.vector_store %arg8[%c0_20, %c0_21], %30 {strides = array<i32>} : memref<8x32xf32, #tpu.memory_space<vmem>>, vector<8x32xf32>,
    } else {
    }
    %c0 = arith.constant 0 : index
    %c0_1 = arith.constant 0 : index
    %3 = vector.load %arg2[%c0, %c0_1] : memref<8x32xf32, #tpu.memory_space<vmem>>, vector<8x32xf32>
    %c0_2 = arith.constant 0 : index
    %c0_3 = arith.constant 0 : index
    %4 = vector.load %arg3[%c0_2, %c0_3] : memref<32x64xf32, #tpu.memory_space<vmem>>, vector<32x64xf32>
    %cst = arith.constant dense<0.000000e+00> : vector<8x64xf32>
    %5 = tpu.matmul %3, %4, %cst {dimension_numbers = #tpu.dot_dimension_numbers<[1], [0], [0], [1], [0, 0, 1, 1], [], []>} : vector<8x32xf32>, vector<32x64xf32>, vector<8x64xf32> -> vector<8x64xf32>
    %c0_4 = arith.constant 0 : index
    %c0_5 = arith.constant 0 : index
    %6 = vector.load %arg4[%c0_4, %c0_5] : memref<1x64xf32, #tpu.memory_space<vmem>>, vector<1x64xf32>
    %7 = vector.broadcast %6 : vector<1x64xf32> to vector<8x64xf32>
    %8 = arith.addf %5, %7 : vector<8x64xf32>
    %9 = arith.mulf %8, %8 : vector<8x64xf32>
    %10 = arith.mulf %8, %9 : vector<8x64xf32>
    %cst_6 = arith.constant 4.471500e-02 : f32
    %11 = vector.broadcast %cst_6 : f32 to vector<8x64xf32>
    %12 = arith.mulf %11, %10 : vector<8x64xf32>
    %13 = arith.addf %8, %12 : vector<8x64xf32>
    %cst_7 = arith.constant 0.797884583 : f32
    %14 = vector.broadcast %cst_7 : f32 to vector<8x64xf32>
    %15 = arith.mulf %14, %13 : vector<8x64xf32>
    %16 = math.tanh %15 : vector<8x64xf32>
    %cst_8 = arith.constant 1.000000e+00 : f32
    %17 = vector.broadcast %cst_8 : f32 to vector<8x64xf32>
    %18 = arith.addf %17, %16 : vector<8x64xf32>
    %cst_9 = arith.constant 5.000000e-01 : f32
    %19 = vector.broadcast %cst_9 : f32 to vector<8x64xf32>
    %20 = arith.mulf %19, %18 : vector<8x64xf32>
    %21 = arith.mulf %8, %20 : vector<8x64xf32>
    %c0_10 = arith.constant 0 : index
    %c0_11 = arith.constant 0 : index
    %22 = vector.load %arg8[%c0_10, %c0_11] : memref<8x32xf32, #tpu.memory_space<vmem>>, vector<8x32xf32>
    %c0_12 = arith.constant 0 : index
    %c0_13 = arith.constant 0 : index
    %23 = vector.load %arg5[%c0_12, %c0_13] : memref<64x32xf32, #tpu.memory_space<vmem>>, vector<64x32xf32>
    %cst_14 = arith.constant dense<0.000000e+00> : vector<8x32xf32>
    %24 = tpu.matmul %21, %23, %cst_14 {dimension_numbers = #tpu.dot_dimension_numbers<[1], [0], [0], [1], [0, 0, 1, 1], [], []>} : vector<8x64xf32>, vector<64x32xf32>, vector<8x32xf32> -> vector<8x32xf32>
    %25 = arith.addf %22, %24 : vector<8x32xf32>
    %c0_15 = arith.constant 0 : index
    %c0_16 = arith.constant 0 : index
    %26 = vector.load %arg8[%c0_15, %c0_16] : memref<8x32xf32, #tpu.memory_space<vmem>>, vector<8x32xf32>
    tpu.vector_store %arg8[%c0_15, %c0_16], %25 {strides = array<i32>} : memref<8x32xf32, #tpu.memory_space<vmem>>, vector<8x32xf32>,
    %c0_i32_17 = arith.constant 0 : i32
    %27 = arith.cmpi eq, %arg1, %c0_i32_17 : i32
    %28 = arith.extui %27 : i1 to i32
    %c0_i32_18 = arith.constant 0 : i32
    %29 = arith.cmpi ne, %28, %c0_i32_18 : i32
    scf.if %29 {
      %c0_19 = arith.constant 0 : index
      %c0_20 = arith.constant 0 : index
      %30 = vector.load %arg8[%c0_19, %c0_20] : memref<8x32xf32, #tpu.memory_space<vmem>>, vector<8x32xf32>
      %c0_21 = arith.constant 0 : index
      %c0_22 = arith.constant 0 : index
      %31 = vector.load %arg6[%c0_21, %c0_22] : memref<1x32xf32, #tpu.memory_space<vmem>>, vector<1x32xf32>
      %32 = vector.broadcast %31 : vector<1x32xf32> to vector<8x32xf32>
      %33 = arith.addf %30, %32 : vector<8x32xf32>
      %c0_23 = arith.constant 0 : index
      %c0_24 = arith.constant 0 : index
      %34 = vector.load %arg7[%c0_23, %c0_24] : memref<8x32xf32, #tpu.memory_space<vmem>>, vector<8x32xf32>
      tpu.vector_store %arg7[%c0_23, %c0_24], %33 {strides = array<i32>} : memref<8x32xf32, #tpu.memory_space<vmem>>, vector<8x32xf32>,
    } else {
    }
    return
  }
  func.func @transform_0(%arg0: i32, %arg1: i32) -> (i32, i32) {
    %c0_i32 = arith.constant 0 : i32
    %c0_i32_0 = arith.constant 0 : i32
    return %arg0, %c0_i32 : i32, i32
  }
  func.func @transform_1(%arg0: i32, %arg1: i32) -> (i32, i32) {
    %c0_i32 = arith.constant 0 : i32
    %c0_i32_0 = arith.constant 0 : i32
    return %c0_i32, %arg1 : i32, i32
  }
  func.func @transform_2(%arg0: i32, %arg1: i32) -> (i32, i32) {
    %c0_i32 = arith.constant 0 : i32
    %c0_i32_0 = arith.constant 0 : i32
    return %c0_i32, %arg1 : i32, i32
  }
  func.func @transform_3(%arg0: i32, %arg1: i32) -> (i32, i32) {
    %c0_i32 = arith.constant 0 : i32
    %c0_i32_0 = arith.constant 0 : i32
    return %arg1, %c0_i32 : i32, i32
  }
  func.func @transform_4(%arg0: i32, %arg1: i32) -> (i32, i32) {
    %c0_i32 = arith.constant 0 : i32
    %c0_i32_0 = arith.constant 0 : i32
    %c0_i32_1 = arith.constant 0 : i32
    return %c0_i32, %c0_i32_0 : i32, i32
  }
  func.func @transform_5(%arg0: i32, %arg1: i32) -> (i32, i32) {
    %c0_i32 = arith.constant 0 : i32
    %c0_i32_0 = arith.constant 0 : i32
    return %arg0, %c0_i32 : i32, i32
  }
}

</mosaic_0001>

<bundles_post_ra>
// kernel: tpu_custom_call.1
= control target key start
LH: loop header
LB: loop body
LE: loop exit
PB: predicated region body
PF: predicated region fallthrough
CT: control target
= control target key end

     0   :  { %10 = vsyncpa [#allocation4], 0  ;;  %s833_s0 = inlined_call_operand.vmem [shape: f32[16,32], index: 0, kind: input, shape index: {}]   ;;  %s834_s1 = inlined_call_operand.vmem [shape: f32[32,64], index: 1, kind: input, shape index: {}]   ;;  %s835_s2 = inlined_call_operand.vmem [shape: f32[1,64], index: 2, kind: input, shape index: {}]   ;;  %s836_s3 = inlined_call_operand.vmem [shape: f32[64,32], index: 3, kind: input, shape index: {}]   ;;  %s837_s4 = inlined_call_operand.vmem [shape: f32[1,32], index: 4, kind: input, shape index: {}]   ;;  %s838_s5 = inlined_call_operand.hbm [shape: f32[16,32], index: 5, kind: output, shape index: {}]  }
   0x1   :  { %12 = vsyncpa [#allocation4 + $0x1], 0  ;;  %s690_s18 = smov 0   ;;  %s692_s19 = smov 0  }
   0x2   :  { %s694_s20 = smov 0   ;;  %s696_s21 = smov 0  }
   0x3   :  { %s698_s22 = smov 0   ;;  %s700_s23 = smov 0  }
   0x4 LB: > { %s503_s24 = sadd.s32 4294967295, %s657_s23   ;;  %s504_s25 = sadd.s32 4294967294, %s657_s23   ;;  %s657_s23 = sphi %s700_s23, %s18_s23   ;;  %s653_s22 = sphi %s698_s22, %s845_s22   ;;  %s649_s21 = sphi %s696_s21, %s844_s21   ;;  %s645_s20 = sphi %s694_s20, %s843_s20   ;;  %s641_s19 = sphi %s692_s19, %s842_s19   ;;  %s637_s18 = sphi %s690_s18, %s841_s18  }
   0x5   : > { %s30_s26 = sadd.s32 1, %s653_s22  ;;  %s162_s27 = sadd.s32 1, %s645_s20 }
   0x6   : > { %p32_p0 = scmp.ge.s32.totalorder %s30_s26, 2  ;;  %p172_p1 = scmp.ne.s32.totalorder %s645_s20, %s641_s19 }
   0x7   : > { %p173_p2 = scmp.eq.s32.totalorder %s503_s24, 1  ;;  %p178_p3 = scmp.ne.s32.totalorder %s641_s19, %s637_s18 }
   0x8   : > { %s847_s26 = smov (%p32_p0, %s30_s26), 0  ;;  %p179_p5 = scmp.eq.s32.totalorder %s504_s25, 1 }
   0x9   : > { %p730_p4 = por %p173_p2, %p172_p1  ;;  %s159_s29 = ssub.s32 %s653_s22, %s847_s26 }
   0xa   : > { %p510_p6 = scmp.ge.s32.totalorder %s657_s23, 1  ;;  %p160_p7 = scmp.eq.s32.totalorder %s159_s29, 0 }
   0xb   : > { %p737_p8 = por %p179_p5, %p178_p3  ;;  %p229_p9 = scmp.lt.s32.totalorder %s657_s23, 3 }
   0xc   : > { %s743_s6 = scalar_select %p160_p7, %s645_s20, %s162_s27  }
   0xd   : > { %p230_p10 = pnand %p510_p6, %p229_p9 }
   0xe   : > { %p268_p11 = scmp.lt.s32.totalorder (!%p230_p10), %s649_s21, 1  ;;  %s265_s8 = sand.u32 (!%p230_p10), 1, %s641_s19  }
   0xf   : > { %233 = sbr.rel (%p230_p10) target bundleno = 320 (0x140), region = 40  ;;  %s511_s9 = sshll.u32 (!%p230_p10), %s265_s8, 3 }
  0x10   : > { %s516_s10 = sshll.u32 (!%p230_p10), %s649_s21, 3 }
  0x14   : > { %v295_v0 = vld [vmem:[%s834_s1 + $0x18] sm:$0xff]  ;;  %v294_v1 = vld [vmem:[%s834_s1 + $0x10] sm:$0xff]  ;;  %vm289_vm0 = vcmask 261120   ;;  %v659_v2 = vmov 0.0   ;;  %v293_v3 = vld [vmem:[%s834_s1 + $0x8] sm:$0xff]  ;;  %s269_s13 = scalar_select %p268_p11, %s649_s21, 1 }
  0x15   : > { %316 = vmatpush.msra.mxu0 %v295_v0  ;;  %290 = vst.msk [vmem:[#allocation2] sm:$0xff] %vm289_vm0, %v659_v2  ;;  %v292_v4 = vld [vmem:[%s834_s1] sm:$0xff]  ;;  %v341_v6 = vld [vmem:[%s836_s3 + $0x38] sm:$0xff]  ;;  %v340_v7 = vld [vmem:[%s836_s3 + $0x30] sm:$0xff]  ;;  %vm342_vm1 = vcmask 523264   ;;  %s379_s21 = scalar_lea.sflag [#allocation4], %s265_s8 }
  0x16   : > { %s512_s16 = sshll.u32 %s269_s13, 3  ;;  %354 = vmatpush.msra.mxu1 %v341_v6  ;;  %v339_v8 = vld [vmem:[%s836_s3 + $0x28] sm:$0xff]  ;;  %v338_v9 = vld [vmem:[%s836_s3 + $0x20] sm:$0xff]  ;;  %v337_v10 = vld [vmem:[%s836_s3 + $0x18] sm:$0xff]  ;;  %s389_s13 = scalar_lea.hbm %s838_s5, %s516_s10 }
  0x17   : > { %317 = vmatpush.msra.mxu0 %v294_v1  ;;  %s271_s25 = scalar_lea.vmem %s833_s0, %s512_s16  ;;  %v336_v11 = vld [vmem:[%s836_s3 + $0x10] sm:$0xff]  ;;  %v335_v12 = vld [vmem:[%s836_s3 + $0x8] sm:$0xff]  ;;  %v334_v13 = vld [vmem:[%s836_s3] sm:$0xff]  ;;  %s267_s16 = scalar_lea.vmem [#allocation3], %s511_s9 }
  0x18   : > { %v291_v5 = vld [vmem:[%s271_s25] sm:$0xff]  ;;  %355 = vmatpush.msra.mxu1 %v340_v7  ;;  %s391_s17 = sshll.u32 %s267_s16, 4  ;;  %s393_s24 = sshll.u32 %s389_s13, 4  ;;  %s392_s17 = int_to_ptr.vmem [resolvable:$true] %s391_s17  ;;  %s394_s24 = int_to_ptr.hbm [resolvable:$true] %s393_s24 }
  0x19   : > { %318 = vmatpush.msra.mxu0 %v293_v3  ;;  %v575_v14 = vld [vmem:[%s835_s2] ss:$0 sm:$0xff]  ;;  %s593_s25 = sshra.s32 %s394_s24, 4  ;;  %s599_s9 = scalar_lea.hbm %s838_s5, 16  ;;  %s594_s25 = int_to_ptr.hbm [resolvable:$true] %s593_s25 }
  0x1a   : > { %356 = vmatpush.msra.mxu1 %v339_v8  ;;  %v576_v29 = vld [vmem:[%s837_s4] ss:$0 sm:$0xff]  ;;  %s595_s27 = scalar_lea.hbm %s594_s25, 8  ;;  %p600_p1 = scmp.lt.s32.totalorder %s594_s25, %s838_s5 }
  0x1b   : > { %319 = vmatpush.msra.mxu0 %v292_v4  ;;  %p596_p12 = scmp.ne.s32.totalorder %s594_s25, %s595_s27  ;;  %p601_p2 = scmp.lt.s32.totalorder %s599_s9, %s595_s27 }
  0x1c   : > { %513 = vmatmul.msk.f32.vlgmr.msra.gmra.mxu0 %vm289_vm0, %v291_v5  ;;  %357 = vmatpush.msra.mxu1 %v338_v9  ;;  %v333_v26 = vld [vmem:[#allocation2] sm:$0xff] }
  0x1d   : > { %p597_p13 = pnand %p596_p12, %p730_p4  ;;  %p602_p3 = por %p601_p2, %p600_p1 }
  0x1e   : > { %358 = vmatpush.msra.mxu1 %v337_v10 }
  0x1f   : > { %p598_p0 = pneg %p597_p13 }
  0x20   : > { %359 = vmatpush.msra.mxu1 %v336_v11 }
  0x21   : > { %p603_p5 = pnand %p602_p3, %p598_p0 }
  0x22   : > { %360 = vmatpush.msra.mxu1 %v335_v12 }
  0x24   : > { %361 = vmatpush.msra.mxu1 %v334_v13 }
  0x99   : > { %v321_v15 = vpop.f32.mrf.mxu0 }
  0x9a   : > { %v322_v16 = vadd.f32 %v575_v14, %v321_v15 }
  0x9c   : > { %v324_v17 = vmul.f32 %v322_v16, %v322_v16 }
  0x9e   : > { %v325_v18 = vmul.f32 %v324_v17, %v322_v16 }
  0xa0   : > { %v326_v19 = vmul.f32 0.044715, %v325_v18 }
  0xa2   : > { %v327_v20 = vadd.f32 %v326_v19, %v322_v16 }
  0xa4   : > { %v328_v21 = vmul.f32 0.7978846, %v327_v20 }
  0xa6   : > { %577 = vtanh.f32 %v328_v21 }
  0xac   : > { %v578_v22 = vpop.eup %577 }
  0xad   : > { %v330_v23 = vadd.f32 1.0, %v578_v22 }
  0xaf   : > { %v331_v24 = vmul.f32 0.5, %v330_v23 }
  0xb1   : > { %v332_v25 = vmul.f32 %v331_v24, %v322_v16 }
  0xb3   : > { %514 = vmatmul.msk.f32.vlgmr.msra.gmra.mxu1 %vm342_vm1, %v332_v25 }
 0x130   : > { %v363_v27 = vpop.f32.mrf.mxu1 }
 0x131   : > { %v366_v28 = vadd.f32 %v363_v27, %v333_v26 }
 0x133   : > { %367 = vst.msk [vmem:[#allocation2] sm:$0xff] %vm289_vm0, %v366_v28 }
 0x13a   : > { %v371_v30 = vld [vmem:[#allocation2] sm:$0xff] }
 0x13b   : > { %v376_v31 = vadd.f32 %v576_v29, %v371_v30 }
 0x13d   : > { %377 = vst.msk [vmem:[%s267_s16] sm:$0xff] %vm289_vm0, %v376_v31 }
 0x13e   : > { %606 = shalt.err (!%p603_p5)
}
 0x13f   : > { %519 = dma.vmem_to_hbm [thread:$0]  (%p730_p4), %s392_s17, 128, %s394_s24, %s379_s21  }
 0x140 PF: > { %p525_p6 = scmp.ge.s32.totalorder %s657_s23, 2  ;;  %s405_s8 = sand.u32 1, %s637_s18  }
 0x141   : > { %s406_s12 = scalar_lea.sflag [#allocation4], %s405_s8 }
 0x142   : > { %p522_p7 = pnand %p525_p6, %p737_p8 }
 0x144   : > { %p523_p9 = pneg %p522_p7 }
 0x146   : > { %632 = dma.done.wait (%p523_p9), %s406_s12, 128  }
 0x147   : > { %634 = vsyncadd (%p523_p9), %s406_s12, 4294967168  ;;  %s18_s23 = sadd.s32 1, %s657_s23   ;;  %s841_s18 = smov %s641_s19 }
 0x148   : > { %p15_p10 = scmp.ge.s32.totalorder %s18_s23, 4   ;;  %s842_s19 = smov %s645_s20 }
 0x149   : > { %s843_s20 = smov %s743_s6  ;;  %s844_s21 = smov %s653_s22 }
 0x14a   : > { %s845_s22 = smov %s847_s26  ;;  %17 = sbr.rel (!%p15_p10) target bundleno = 4 (0x4), region = 92 }
 0x14f   :  { %412 = vsyncpa [#allocation4], 1 }
 0x150   :  { %414 = vsyncpa [#allocation4 + $0x1], 1 }

</bundles_post_ra>
